<compile_context>
chip_gen: v6e
topology: v6e:2x2x1
jax: 0.10.0
libtpu: 0.0.40
codegen_flags: <defaults>
</compile_context>

<pallas_src>
import functools

import jax
import jax.numpy as jnp
import numpy as np
from jax.experimental import pallas as pl
from jax.experimental.pallas import tpu as pltpu


# ---------------------------------------------------------------------------
# Kernels
# ---------------------------------------------------------------------------

def _sparsify_kernel(params_ref, x_ref, o_ref, *, compute_dtype):
    """Elementwise shift + threshold sparsification, cast to matmul dtype."""
    mode = params_ref[0].astype(compute_dtype)
    threshold = params_ref[1].astype(compute_dtype)
    x = x_ref[...].astype(compute_dtype)
    x_shift = x - mode
    x_sparse = jnp.where(jnp.abs(x_shift) <= threshold,
                         jnp.zeros((), compute_dtype), x_shift)
    o_ref[...] = x_sparse.astype(o_ref.dtype)


def _scap_single_k_kernel(params_ref, x_ref, w_ref, b_ref, o_ref, *,
                          sparsify, compute_dtype, matmul_dtype):
    """K fits in one tile: no accumulator scratch, no K loop."""
    x = x_ref[...]
    if sparsify:
        mode = params_ref[0].astype(compute_dtype)
        threshold = params_ref[1].astype(compute_dtype)
        xs = x.astype(compute_dtype) - mode
        x = jnp.where(jnp.abs(xs) <= threshold, jnp.zeros((), compute_dtype), xs)
    x = x.astype(matmul_dtype)
    acc = jnp.dot(x, w_ref[...], preferred_element_type=jnp.float32)
    o_ref[...] = (acc + b_ref[...]).astype(o_ref.dtype)


def _scap_multi_k_kernel(params_ref, x_ref, w_ref, b_ref, o_ref, acc_ref, *,
                         sparsify, compute_dtype, matmul_dtype):
    """General case: K-reduction over grid axis 2 with an f32 accumulator."""
    # Initialize the accumulator with the (folded) bias at the first K step.
    @pl.when(pl.program_id(2) == 0)
    def _():
        acc_ref[...] = jnp.broadcast_to(b_ref[...], acc_ref.shape)

    x = x_ref[...]
    if sparsify:
        mode = params_ref[0].astype(compute_dtype)
        threshold = params_ref[1].astype(compute_dtype)
        xs = x.astype(compute_dtype) - mode
        x = jnp.where(jnp.abs(xs) <= threshold, jnp.zeros((), compute_dtype), xs)
    x = x.astype(matmul_dtype)
    acc_ref[...] += jnp.dot(x, w_ref[...], preferred_element_type=jnp.float32)

    # Pure cast + store epilogue.
    @pl.when(pl.program_id(2) == pl.num_programs(2) - 1)
    def _():
        o_ref[...] = acc_ref[...].astype(o_ref.dtype)


# ---------------------------------------------------------------------------
# Helpers
# ---------------------------------------------------------------------------

def _round_up(x, m):
    return ((x + m - 1) // m) * m


def _cdiv(a, b):
    return -(-a // b)


def _pad_to(x, axis, mult):
    size = x.shape[axis]
    pad = (-size) % mult
    if pad == 0:
        return x
    widths = [(0, 0)] * x.ndim
    widths[axis] = (0, pad)
    return jnp.pad(x, widths)


def _vmem_capacity_bytes():
    """Per-core VMEM capacity; conservative 64 MiB (v7x) fallback."""
    try:
        cap = int(getattr(pltpu.get_tpu_info(), "vmem_capacity_bytes", 0))
        if cap > 0:
            return cap
    except Exception:
        pass
    return 64 << 20


# ---------------------------------------------------------------------------
# One-time parameter preparation (HOIST THIS OUT OF THE HOT PATH)
# ---------------------------------------------------------------------------

def prepare_scap_params(weight, bias, mode, *, matmul_dtype=None):
    """Precompute the [K, N]-layout weight and the folded bias ONCE.

    weight: [out_features, in_features] (PyTorch nn.Linear layout)
    bias:   [out_features] or None
    Returns (w_t [K, N] in matmul dtype, bias_total [N] f32).
    """
    weight = jnp.asarray(weight)
    mm_dtype = jnp.dtype(matmul_dtype) if matmul_dtype is not None \
        else jnp.dtype(weight.dtype)
    extra_bias = jnp.float32(mode) * jnp.sum(weight.astype(jnp.float32), axis=1)
    if bias is None:
        bias_total = extra_bias
    else:
        bias_total = jnp.asarray(bias).astype(jnp.float32) + extra_bias
    w_t = weight.T.astype(mm_dtype)
    return w_t, bias_total


# ---------------------------------------------------------------------------
# Main entry point (prepared operands)
# ---------------------------------------------------------------------------

def scap_linear_apply(x, w_t, bias_total, mode, threshold, *,
                      tm=None, tn=None, tk=None, presparsify=None):
    """SCAPLinear forward with pre-prepared operands.

    x:          [..., in_features]
    w_t:        [in_features, out_features]  (already transposed; matmul dtype)
    bias_total: [out_features] f32           (bias + mode * W.sum(axis=1))
    """
    K, N = w_t.shape
    orig_shape = x.shape
    x2d = x.reshape(-1, K)
    M = x2d.shape[0]

    x_dtype = jnp.dtype(x.dtype)
    mm_dtype = jnp.dtype(w_t.dtype)
    out_dtype = x_dtype
    x_it, mm_it, out_it = x_dtype.itemsize, mm_dtype.itemsize, out_dtype.itemsize

    # Sparsify in the input's native dtype when it is a 16-bit float (native
    # bf16 VALU on v6e/v7x); f32 inputs keep exact f32 threshold decisions.
    if x_dtype in (jnp.dtype(jnp.bfloat16), jnp.dtype(jnp.float16)):
        compute_dtype = x_dtype
    else:
        compute_dtype = jnp.dtype(jnp.float32)

    # Sublane packing minimum for the second-minor tile dims.
    sub_min = max(8, 32 // x_it, 32 // mm_it, 32 // out_it)

    Mr = _round_up(max(M, 1), sub_min)
    Nr = _round_up(max(N, 1), 128)
    Kr = _round_up(max(K, 1), 128)

    # Generation-aware VMEM budget: ~3/4 of per-core capacity for kernel tiles
    # (~96 MiB on v5e/v6e with 128 MiB VMEM, ~48 MiB on v7x with 64 MiB).
    cap = _vmem_capacity_bytes()
    budget = (cap * 3) // 4

    # K tile does not change HBM traffic; keep it moderate so VMEM goes to tm/tn.
    tk = min(512, Kr) if tk is None else min(_round_up(tk, 128), Kr)
    Kp = _round_up(Kr, tk)

    op_it = max(x_it, mm_it)   # worst-case itemsize of the LHS operand tile

    def _vmem_use(tm_c, tn_c):
        use = (2 * tm_c * tk * op_it          # double-buffered x (or xs) tiles
               + 2 * tk * tn_c * mm_it        # double-buffered weight tiles
               + 2 * tn_c * 4                 # bias tiles
               + 2 * tm_c * tn_c * out_it)    # double-buffered output tiles
        if Kr > tk:
            use += tm_c * tn_c * 4            # f32 accumulator scratch
        return use

    user_tm, user_tn = tm, tn
    if user_tm is not None:
        tm_cands = [min(_round_up(user_tm, sub_min), Mr)]
    else:
        tm_cands = sorted({min(Mr, v)
                           for v in (128, 256, 384, 512, 768, 1024, 1536, 2048, Mr)})
    if user_tn is not None:
        tn_cands = [min(_round_up(user_tn, 128), Nr)]
    elif Nr >= 256:
        # Multiples of 256 keep the MXU column passes full on v6e/v7x.
        tn_cands = sorted({min(Nr, v)
                           for v in (256, 512, 768, 1024, 1536, 2048, Nr)})
    else:
        tn_cands = [Nr]

    # Pick (tm, tn) minimizing modeled HBM traffic subject to the VMEM budget.
    best = None
    for tm_c in tm_cands:
        for tn_c in tn_cands:
            feasible = _vmem_use(tm_c, tn_c) <= budget
            Mp_c = _round_up(Mr, tm_c)
            Np_c = _round_up(Nr, tn_c)
            traffic = (Mp_c * Kp * x_it * (Np_c // tn_c)        # x re-streamed per N tile
                       + Kp * Np_c * mm_it * (Mp_c // tm_c)     # W re-streamed per M tile
                       + Mp_c * Np_c * out_it)                  # output writes
            steps = (Mp_c // tm_c) * (Np_c // tn_c)
            key = (0 if feasible else 1, traffic, steps, -tn_c, -tm_c)
            if best is None or key < best[0]:
                best = (key, tm_c, tn_c)
    tm, tn = best[1], best[2]

    # Megacore: avoid collapsing the parallel grid to a single program when the
    # problem is large enough for a meaningful split (v7x has 2 TensorCores).
    if (user_tm is None and user_tn is None
            and (_round_up(Mr, tm) // tm) * (_round_up(Nr, tn) // tn) == 1):
        if Mr >= 512:
            tm = _round_up(_cdiv(Mr, 2), sub_min)
        elif Nr >= 512:
            tn = _round_up(_cdiv(Nr, 2), 128)

    Mp = _round_up(Mr, tm)
    Np = _round_up(Nr, tn)
    n_k = Kp // tk
    n_j = Np // tn

    # Pad operands.  Zero-padded K rows of w_t contribute 0, so the (-mode)
    # values in padded x columns never affect valid outputs; padded M rows /
    # N columns are sliced off below.
    x_p = _pad_to(_pad_to(x2d, 0, Mp), 1, Kp)
    w_p = _pad_to(_pad_to(w_t, 0, Kp), 1, Np)
    b_p = _pad_to(bias_total.astype(jnp.float32).reshape(1, -1), 1, Np)

    # Runtime scalars in SMEM (no recompile when mode/threshold change).
    params = jnp.array([mode, threshold], dtype=jnp.float32)

    # Two-pass mode: sparsify (and cast) x once instead of once per N tile.
    # Worth it when x would be re-sparsified many times or gets narrower.
    if presparsify is None:
        presparsify = (n_j >= 4) or (n_j >= 2 and mm_it < x_it)

    if presparsify:
        sp_need = 2 * tm * tk * (x_it + mm_it)
        sp_limit = int(min(max(sp_need + (4 << 20), 32 << 20), cap - (2 << 20)))
        x_in = pl.pallas_call(
            functools.partial(_sparsify_kernel, compute_dtype=compute_dtype),
            out_shape=jax.ShapeDtypeStruct((Mp, Kp), mm_dtype),
            grid_spec=pltpu.PrefetchScalarGridSpec(
                num_scalar_prefetch=1,
                grid=(Mp // tm, Kp // tk),
                in_specs=[pl.BlockSpec((tm, tk), lambda i, k, p: (i, k))],
                out_specs=pl.BlockSpec((tm, tk), lambda i, k, p: (i, k)),
            ),
            compiler_params=pltpu.CompilerParams(
                dimension_semantics=("parallel", "parallel"),
                vmem_limit_bytes=sp_limit),
        )(params, x_p)
        kernel_sparsify = False
        x_in_it = mm_it
    else:
        x_in = x_p
        kernel_sparsify = True
        x_in_it = x_it

    # Explicit VMEM limit sized for this call's tiles (never above capacity).
    need = (2 * tm * tk * x_in_it + 2 * tk * tn * mm_it
            + 2 * tn * 4 + 2 * tm * tn * out_it)
    if n_k > 1:
        need += tm * tn * 4
    vmem_limit = int(min(max(need + (8 << 20), 32 << 20), cap - (2 << 20)))

    out_shape = jax.ShapeDtypeStruct((Mp, Np), out_dtype)

    if n_k == 1:
        kernel = functools.partial(_scap_single_k_kernel,
                                   sparsify=kernel_sparsify,
                                   compute_dtype=compute_dtype,
                                   matmul_dtype=mm_dtype)
        out_p = pl.pallas_call(
            kernel,
            out_shape=out_shape,
            grid_spec=pltpu.PrefetchScalarGridSpec(
                num_scalar_prefetch=1,
                grid=(Mp // tm, Np // tn),
                in_specs=[
                    pl.BlockSpec((tm, Kp), lambda i, j, p: (i, 0)),   # x tile
                    pl.BlockSpec((Kp, tn), lambda i, j, p: (0, j)),   # W.T tile
                    pl.BlockSpec((1, tn), lambda i, j, p: (0, j)),    # bias tile
                ],
                out_specs=pl.BlockSpec((tm, tn), lambda i, j, p: (i, j)),
            ),
            compiler_params=pltpu.CompilerParams(
                dimension_semantics=("parallel", "parallel"),
                vmem_limit_bytes=vmem_limit),
        )(params, x_in, w_p, b_p)
    else:
        kernel = functools.partial(_scap_multi_k_kernel,
                                   sparsify=kernel_sparsify,
                                   compute_dtype=compute_dtype,
                                   matmul_dtype=mm_dtype)
        out_p = pl.pallas_call(
            kernel,
            out_shape=out_shape,
            grid_spec=pltpu.PrefetchScalarGridSpec(
                num_scalar_prefetch=1,
                grid=(Mp // tm, Np // tn, n_k),
                in_specs=[
                    pl.BlockSpec((tm, tk), lambda i, j, k, p: (i, k)),  # x tile
                    pl.BlockSpec((tk, tn), lambda i, j, k, p: (k, j)),  # W.T tile
                    pl.BlockSpec((1, tn), lambda i, j, k, p: (0, j)),   # bias tile
                ],
                out_specs=pl.BlockSpec((tm, tn), lambda i, j, k, p: (i, j)),
                scratch_shapes=[pltpu.VMEM((tm, tn), jnp.float32)],
            ),
            compiler_params=pltpu.CompilerParams(
                dimension_semantics=("parallel", "parallel", "arbitrary"),
                vmem_limit_bytes=vmem_limit),
        )(params, x_in, w_p, b_p)

    out = out_p[:M, :N]
    return out.reshape(*orig_shape[:-1], N)

    # TODO(synk): the class-level sparsity_info AverageMeter (host-side stateful
    # statistic via .item()) is not reproduced in the kernel.


# ---------------------------------------------------------------------------
# Convenience wrapper with the original (weight, bias) signature.
# For repeated calls, hoist prepare_scap_params() out of the hot path.
# ---------------------------------------------------------------------------

def scap_linear(x, weight, bias, mode, threshold, *,
                tm=None, tn=None, tk=None, matmul_dtype=None, presparsify=None):
    w_t, bias_total = prepare_scap_params(weight, bias, mode,
                                          matmul_dtype=matmul_dtype)
    return scap_linear_apply(x, w_t, bias_total, mode, threshold,
                             tm=tm, tn=tn, tk=tk, presparsify=presparsify)


# ---------------------------------------------------------------------------
# Self-test
# ---------------------------------------------------------------------------

if __name__ == "__main__":
    key = jax.random.PRNGKey(0)
    k_x, k_w, k_b, k_x2, k_w2, k_x3, k_w3 = jax.random.split(key, 7)

    def reference(x, weight, bias, mode, threshold):
        x_shift = x - mode
        sparse = jnp.where(jnp.abs(x_shift) <= threshold, 0.0, x_shift)
        bias_total = mode * jnp.sum(weight, axis=1)
        if bias is not None:
            bias_total = bias_total + bias
        return jnp.einsum("...k,nk->...n", sparse, weight) + bias_total

    mode, threshold = 0.1, 0.05

    # Test 1: small shapes, single-K fast path, prepared (hoisted) operands.
    batch, seq, in_features, out_features = 2, 8, 32, 64
    x = jax.random.normal(k_x, (batch, seq, in_features), dtype=jnp.float32)
    weight = jax.random.normal(k_w, (out_features, in_features),
                               dtype=jnp.float32) * 0.1
    bias = jax.random.normal(k_b, (out_features,), dtype=jnp.float32) * 0.1

    w_t, b_tot = prepare_scap_params(weight, bias, mode)
    y = jax.block_until_ready(scap_linear_apply(x, w_t, b_tot, mode, threshold))
    y_ref = reference(x, weight, bias, mode, threshold)
    np.testing.assert_allclose(np.asarray(y), np.asarray(y_ref),
                               rtol=1e-5, atol=1e-5)

    # Test 2: multi-K accumulation path (K=256, tk=128 -> 2 K steps), no bias,
    # via the convenience wrapper.
    in2 = 256
    x2 = jax.random.normal(k_x2, (batch, seq, in2), dtype=jnp.float32)
    w2 = jax.random.normal(k_w2, (out_features, in2), dtype=jnp.float32) * 0.1
    y2 = jax.block_until_ready(scap_linear(x2, w2, None, mode, threshold, tk=128))
    y2_ref = reference(x2, w2, None, mode, threshold)
    np.testing.assert_allclose(np.asarray(y2), np.asarray(y2_ref),
                               rtol=1e-5, atol=1e-5)

    # Test 3: forced two-pass pre-sparsify path + multi-K + multi-N-tile grid.
    out3 = 256
    x3 = jax.random.normal(k_x3, (batch, seq, in2), dtype=jnp.float32)
    w3 = jax.random.normal(k_w3, (out3, in2), dtype=jnp.float32) * 0.1
    w3_t, b3_tot = prepare_scap_params(w3, None, mode)
    y3 = jax.block_until_ready(
        scap_linear_apply(x3, w3_t, b3_tot, mode, threshold,
                          tk=128, tn=128, presparsify=True))
    y3_ref = reference(x3, w3, None, mode, threshold)
    np.testing.assert_allclose(np.asarray(y3), np.asarray(y3_ref),
                               rtol=1e-5, atol=1e-5)

    # Test 4: bf16 matmul operands (mask decided in f32, dot in bf16) —
    # loosened tolerance for bf16 rounding.
    w_t16, b16 = prepare_scap_params(weight, bias, mode, matmul_dtype=jnp.bfloat16)
    y4 = jax.block_until_ready(scap_linear_apply(x, w_t16, b16, mode, threshold))
    np.testing.assert_allclose(np.asarray(y4), np.asarray(y_ref),
                               rtol=2e-2, atol=5e-2)

    print("KERNEL_OK")
</pallas_src>

<mosaic_0001>
module attributes {stable_mosaic.version = 11 : i64} {
  func.func @_scap_single_k_kernel(%arg0: i32, %arg1: i32, %arg2: memref<2xf32, #tpu.memory_space<smem>>, %arg3: memref<16x128xf32, #tpu.memory_space<vmem>>, %arg4: memref<128x128xf32, #tpu.memory_space<vmem>>, %arg5: memref<1x128xf32, #tpu.memory_space<vmem>>, %arg6: memref<16x128xf32, #tpu.memory_space<vmem>>) attributes {dimension_semantics = [#tpu.dimension_semantics<parallel>, #tpu.dimension_semantics<parallel>], iteration_bounds = array<i64: 1, 1>, scalar_prefetch = 1 : i64, scratch_operands = 0 : i64, tpu.core_type = #tpu.core_type<tc>, window_params = [{transform_indices = @transform_0, window_bounds = array<i64: 16, 128>}, {transform_indices = @transform_1, window_bounds = array<i64: 128, 128>}, {transform_indices = @transform_2, window_bounds = array<i64: 1, 128>}, {transform_indices = @transform_3, window_bounds = array<i64: 16, 128>}]} {
    %c0 = arith.constant 0 : index
    %c0_0 = arith.constant 0 : index
    %0 = vector.load %arg3[%c0, %c0_0] : memref<16x128xf32, #tpu.memory_space<vmem>>, vector<16x128xf32>
    %c0_1 = arith.constant 0 : index
    %1 = memref.load %arg2[%c0_1] : memref<2xf32, #tpu.memory_space<smem>>
    %c1 = arith.constant 1 : index
    %2 = memref.load %arg2[%c1] : memref<2xf32, #tpu.memory_space<smem>>
    %3 = vector.broadcast %1 : f32 to vector<16x128xf32>
    %4 = arith.subf %0, %3 : vector<16x128xf32>
    %5 = math.absf %4 : vector<16x128xf32>
    %6 = vector.broadcast %2 : f32 to vector<16x128xf32>
    %7 = arith.cmpf ole, %5, %6 : vector<16x128xf32>
    %cst = arith.constant 0.000000e+00 : f32
    %8 = vector.broadcast %cst : f32 to vector<16x128xf32>
    %9 = arith.select %7, %8, %4 : vector<16x128xi1>, vector<16x128xf32>
    %c0_2 = arith.constant 0 : index
    %c0_3 = arith.constant 0 : index
    %10 = vector.load %arg4[%c0_2, %c0_3] : memref<128x128xf32, #tpu.memory_space<vmem>>, vector<128x128xf32>
    %cst_4 = arith.constant dense<0.000000e+00> : vector<16x128xf32>
    %11 = tpu.matmul %9, %10, %cst_4 {dimension_numbers = #tpu.dot_dimension_numbers<[1], [0], [0], [1], [0, 0, 1, 1], [], []>} : vector<16x128xf32>, vector<128x128xf32>, vector<16x128xf32> -> vector<16x128xf32>
    %c0_5 = arith.constant 0 : index
    %c0_6 = arith.constant 0 : index
    %12 = vector.load %arg5[%c0_5, %c0_6] : memref<1x128xf32, #tpu.memory_space<vmem>>, vector<1x128xf32>
    %13 = vector.broadcast %12 : vector<1x128xf32> to vector<16x128xf32>
    %14 = arith.addf %11, %13 : vector<16x128xf32>
    %c0_7 = arith.constant 0 : index
    %c0_8 = arith.constant 0 : index
    %15 = vector.load %arg6[%c0_7, %c0_8] : memref<16x128xf32, #tpu.memory_space<vmem>>, vector<16x128xf32>
    tpu.vector_store %arg6[%c0_7, %c0_8], %14 {strides = array<i32>} : memref<16x128xf32, #tpu.memory_space<vmem>>, vector<16x128xf32>,
    return
  }
  func.func @transform_0(%arg0: i32, %arg1: i32, %arg2: memref<2xf32, #tpu.memory_space<smem>>) -> (i32, i32) {
    %c0_i32 = arith.constant 0 : i32
    %c0_i32_0 = arith.constant 0 : i32
    return %arg0, %c0_i32 : i32, i32
  }
  func.func @transform_1(%arg0: i32, %arg1: i32, %arg2: memref<2xf32, #tpu.memory_space<smem>>) -> (i32, i32) {
    %c0_i32 = arith.constant 0 : i32
    %c0_i32_0 = arith.constant 0 : i32
    return %c0_i32, %arg1 : i32, i32
  }
  func.func @transform_2(%arg0: i32, %arg1: i32, %arg2: memref<2xf32, #tpu.memory_space<smem>>) -> (i32, i32) {
    %c0_i32 = arith.constant 0 : i32
    %c0_i32_0 = arith.constant 0 : i32
    return %c0_i32, %arg1 : i32, i32
  }
  func.func @transform_3(%arg0: i32, %arg1: i32, %arg2: memref<2xf32, #tpu.memory_space<smem>>) -> (i32, i32) {
    %c0_i32 = arith.constant 0 : i32
    return %arg0, %arg1 : i32, i32
  }
}

</mosaic_0001>

<bundles_post_ra>
// kernel: tpu_custom_call.1
= control target key start
LH: loop header
LB: loop body
LE: loop exit
PB: predicated region body
PF: predicated region fallthrough
CT: control target
= control target key end

     0   :  { %s321_s15 = smov [#allocation3]   ;;  %s382_s0 = inlined_call_operand.hbm [shape: f32[2], index: 0, kind: input, shape index: {}]   ;;  %s383_s1 = inlined_call_operand.hbm [shape: f32[16,128], index: 1, kind: input, shape index: {}]   ;;  %s384_s2 = inlined_call_operand.hbm [shape: f32[128,128], index: 2, kind: input, shape index: {}]   ;;  %s385_s3 = inlined_call_operand.vmem [shape: f32[1,128], index: 3, kind: input, shape index: {}]   ;;  %s386_s4 = inlined_call_operand.hbm [shape: f32[16,128], index: 4, kind: output, shape index: {}]  }
   0x1   :  { %10 = dma.hbm_to_smem %s382_s0, 16, %s321_s15, [#allocation2] }
   0x2   :  { %313 = dma.done.wait [#allocation2], 16 }
   0x3   :  { %314 = vsyncadd [#allocation2], 4294967280 }
   0x4   :  { %12 = sfence }
   0x5   :  { %13 = vsyncpa [#allocation5], 0 }
   0x6   :  { %14 = vsyncpa [#allocation8], 0 }
   0x7   :  { %15 = vsyncpa [#allocation6], 0  ;;  %s322_s18 = smov [#allocation4]  }
   0x8   :  { %s21_s19 = sshll.u32 %s322_s18, 4  ;;  %s22_s19 = int_to_ptr.vmem [resolvable:$true] %s21_s19 }
   0x9   :  { %s261_s20 = scalar_lea.vmem %s22_s19, 256  ;;  %p266_p1 = scmp.lt.s32.totalorder %s22_s19, %s22_s19 }
   0xa   :  { %p262_p0 = scmp.ne.s32.totalorder %s22_s19, %s261_s20  ;;  %p267_p2 = scmp.lt.s32.totalorder %s261_s20, %s261_s20 }
   0xc   :  { %p268_p3 = por %p267_p2, %p266_p1 }
   0xe   :  { %p269_p4 = pnand %p268_p3, %p262_p0 }
  0x10   :  { %272 = shalt.err (!%p269_p4)
}
  0x11   :  { %s323_s21 = smov 128   ;;  %s324_s22 = smov 8  }
  0x12   :  { %27 = dma.hbm_to_vmem [thread:$0]  %s383_s1, 256, %s22_s19, [#allocation5], %s323_s21, %s323_s21, %s324_s22  }
  0x13   :  { %s325_s24 = smov [#allocation7]  }
  0x14   :  { %s33_s25 = sshll.u32 %s325_s24, 4  ;;  %s34_s25 = int_to_ptr.vmem [resolvable:$true] %s33_s25 }
  0x15   :  { %s281_s26 = scalar_lea.vmem %s34_s25, 2048  ;;  %p286_p6 = scmp.lt.s32.totalorder %s34_s25, %s34_s25 }
  0x16   :  { %p282_p5 = scmp.ne.s32.totalorder %s34_s25, %s281_s26  ;;  %p287_p7 = scmp.lt.s32.totalorder %s281_s26, %s281_s26 }
  0x18   :  { %p288_p8 = por %p287_p7, %p286_p6 }
  0x1a   :  { %p289_p9 = pnand %p288_p8, %p282_p5 }
  0x1c   :  { %292 = shalt.err (!%p289_p9)
}
  0x1d   :  { %39 = dma.hbm_to_vmem [thread:$0]  %s384_s2, 2048, %s34_s25, [#allocation8], %s323_s21, %s323_s21, %s324_s22  }
  0x1e   :  { %315 = dma.done.wait [#allocation5], 256  }
  0x1f   :  { %316 = vsyncadd [#allocation5], 4294967040 }
  0x20   :  { %317 = dma.done.wait [#allocation8], 2048  }
  0x21   :  { %318 = vsyncadd [#allocation8], 4294965248  ;;  %s367_s1 = sld [smem:[#allocation3]]  ;;  %v77_v0 = vld [vmem:[#allocation7 + $0x78] sm:$0xff]  ;;  %v76_v1 = vld [vmem:[#allocation7 + $0x70] sm:$0xff]  ;;  %s326_s5 = smov [#allocation9]  }
  0x22   :  { %s369_s29 = sld [smem:[#allocation3 + $0x1]]  ;;  %204 = vmatprep.subr.mxu0 %v77_v0  ;;  %v75_v2 = vld [vmem:[#allocation7 + $0x68] sm:$0xff]  ;;  %v74_v4 = vld [vmem:[#allocation7 + $0x60] sm:$0xff]  ;;  %v48_v5 = vld [vmem:[#allocation4] sm:$0xff]  ;;  %s167_s6 = sshll.u32 %s326_s5, 4  ;;  %s168_s6 = int_to_ptr.vmem [resolvable:$true] %s167_s6 }
  0x23   :  { %205 = vmatpush3.msra.mxu0 %v77_v0  ;;  %v73_v6 = vld [vmem:[#allocation7 + $0x58] sm:$0xff]  ;;  %v72_v9 = vld [vmem:[#allocation7 + $0x50] sm:$0xff]  ;;  %v71_v11 = vld [vmem:[#allocation7 + $0x48] sm:$0xff]  ;;  %s293_s7 = scalar_lea.vmem %s168_s6, 256  ;;  %p298_p11 = scmp.lt.s32.totalorder %s168_s6, %s168_s6 }
  0x24   :  { %206 = vmatprep.subr.mxu0 %v76_v1  ;;  %v70_v12 = vld [vmem:[#allocation7 + $0x40] sm:$0xff]  ;;  %v69_v13 = vld [vmem:[#allocation7 + $0x38] sm:$0xff]  ;;  %v68_v14 = vld [vmem:[#allocation7 + $0x30] sm:$0xff]  ;;  %p294_p10 = scmp.ne.s32.totalorder %s168_s6, %s293_s7  ;;  %p299_p12 = scmp.lt.s32.totalorder %s293_s7, %s293_s7 }
  0x25   :  { %207 = vmatpush3.msra.mxu0 %v76_v1  ;;  %v49_v15 = vld [vmem:[#allocation4 + $0x8] sm:$0xff]  ;;  %v67_v16 = vld [vmem:[#allocation7 + $0x28] sm:$0xff]  ;;  %v66_v18 = vld [vmem:[#allocation7 + $0x20] sm:$0xff] }
  0x26   :  { %208 = vmatprep.subr.mxu0 %v75_v2  ;;  %v65_v19 = vld [vmem:[#allocation7 + $0x18] sm:$0xff]  ;;  %v64_v21 = vld [vmem:[#allocation7 + $0x10] sm:$0xff]  ;;  %v63_v22 = vld [vmem:[#allocation7 + $0x8] sm:$0xff]  ;;  %p300_p13 = por %p299_p12, %p298_p11 }
  0x27   :  { %v52_v3 = vstv %s367_s1  ;;  %209 = vmatpush3.msra.mxu0 %v75_v2  ;;  %v62_v23 = vld [vmem:[#allocation7] sm:$0xff]  ;;  %v181_v24 = vld [vmem:[%s385_s3] ss:$0 sm:$0xff] }
  0x28   :  { %v53_v7 = vsub.f32 %v48_v5, %v52_v3  ;;  %210 = vmatprep.subr.mxu0 %v74_v4  ;;  %v57_v8 = vstv %s369_s29  ;;  %v54_v17 = vsub.f32 %v49_v15, %v52_v3  ;;  %p301_p0 = pnand %p300_p13, %p294_p10 }
  0x29   :  { %211 = vmatpush3.msra.mxu0 %v74_v4 }
  0x2a   :  { %v55_v10 = vand.u32 2147483647, %v53_v7  ;;  %212 = vmatprep.subr.mxu0 %v73_v6  ;;  %v56_v20 = vand.u32 2147483647, %v54_v17 }
  0x2b   :  { %213 = vmatpush3.msra.mxu0 %v73_v6 }
  0x2c   :  { %vm58_vm0 = vcmp.le.f32.partialorder %v55_v10, %v57_v8  ;;  %214 = vmatprep.subr.mxu0 %v72_v9  ;;  %vm59_vm2 = vcmp.le.f32.partialorder %v56_v20, %v57_v8 }
  0x2d   :  { %vm182_vm1 = vmneg %vm58_vm0  ;;  %215 = vmatpush3.msra.mxu0 %v72_v9 }
  0x2e   :  { %236 = vmatprep.mubr.msk.f32.mxu0 %vm182_vm1, %v53_v7  ;;  %216 = vmatprep.subr.mxu0 %v71_v11  ;;  %vm184_vm3 = vmneg %vm59_vm2 }
  0x2f   :  { %217 = vmatpush3.msra.mxu0 %v71_v11 }
  0x30   :  { %218 = vmatprep.subr.mxu0 %v70_v12 }
  0x31   :  { %219 = vmatpush3.msra.mxu0 %v70_v12 }
  0x32   :  { %220 = vmatprep.subr.mxu0 %v69_v13 }
  0x33   :  { %221 = vmatpush3.msra.mxu0 %v69_v13 }
  0x34   :  { %222 = vmatprep.subr.mxu0 %v68_v14 }
  0x35   :  { %223 = vmatpush3.msra.mxu0 %v68_v14 }
  0x36   :  { %224 = vmatprep.subr.mxu0 %v67_v16 }
  0x37   :  { %225 = vmatpush3.msra.mxu0 %v67_v16 }
  0x38   :  { %226 = vmatprep.subr.mxu0 %v66_v18 }
  0x39   :  { %227 = vmatpush3.msra.mxu0 %v66_v18 }
  0x3a   :  { %228 = vmatprep.subr.mxu0 %v65_v19 }
  0x3b   :  { %229 = vmatpush3.msra.mxu0 %v65_v19 }
  0x3c   :  { %230 = vmatprep.subr.mxu0 %v64_v21 }
  0x3d   :  { %231 = vmatpush3.msra.mxu0 %v64_v21 }
  0x3e   :  { %232 = vmatprep.subr.mxu0 %v63_v22 }
  0x3f   :  { %233 = vmatpush3.msra.mxu0 %v63_v22 }
  0x40   :  { %234 = vmatprep.subr.mxu0 %v62_v23 }
  0x41   :  { %235 = vmatpush3.msra.mxu0 %v62_v23 }
  0x42   :  { %237 = vmatmul.mubr.msk.f32.vlgmr.msra.gmra.mxu0 %vm184_vm3, %v54_v17 }
 0x102   :  { %v238_v25 = vpop.f32.mrf.mxu0 }
 0x103   :  { %v157_v26 = vadd.f32 %v238_v25, %v181_v24 }
 0x104   :  { %v151_v27 = vpop.f32.mrf.mxu0 }
 0x105   :  { %161 = vst [vmem:[#allocation9 + $0x8] sm:$0xff] %v157_v26  ;;  %v152_v28 = vadd.f32 %v181_v24, %v151_v27 }
 0x107   :  { %160 = vst [vmem:[#allocation9] sm:$0xff] %v152_v28 }
 0x108   :  { %304 = shalt.err (!%p301_p0)
}
 0x109   :  { %173 = dma.vmem_to_hbm [thread:$0]  %s168_s6, 256, %s386_s4, [#allocation6], %s323_s21, %s323_s21, %s324_s22  }
 0x10a   :  { %319 = dma.done.wait [#allocation6], 256  }
 0x10b   :  { %320 = vsyncadd [#allocation6], 4294967040 }
 0x10c   :  { %177 = vsyncpa [#allocation5], 1 }
 0x10d   :  { %178 = vsyncpa [#allocation8], 1 }
 0x10e   :  { %179 = vsyncpa [#allocation6], 1 }

</bundles_post_ra>
